<compile_context>
chip_gen: v6e
topology: v6e:2x2x1
jax: 0.10.0
libtpu: 0.0.40
codegen_flags: <defaults>
</compile_context>

<pallas_src>
import functools

import jax
import jax.numpy as jnp
from jax import lax
from jax.experimental import pallas as pl
from jax.experimental.pallas import tpu as pltpu


def _lstm_mean_fc_kernel(x_ref, wih_ref, whh_ref, b_ref, wfc_ref, bfc_ref,
                         out_ref, xp_sc):
    T, B, E = x_ref.shape
    H = whh_ref.shape[0]

    # ---- One big MXU matmul for all input projections: (T*B, E) @ (E, 4H) ----
    x_all = x_ref[...].reshape(T * B, E)                      # bf16
    xp = jnp.dot(x_all, wih_ref[...],
                 preferred_element_type=jnp.float32)          # (T*B, 4H) f32
    xp_sc[...] = xp.reshape(T, B, 4 * H) + b_ref[...]         # bias folded once

    w_hh = whh_ref[...]                                       # bf16 (H, 4H)

    # ---- Serial recurrence over T, state carried in f32 registers ----
    def step(t, carry):
        h, c, s = carry                                       # (B, H) f32 each
        gates = xp_sc[t] + jnp.dot(h.astype(jnp.bfloat16), w_hh,
                                   preferred_element_type=jnp.float32)
        sig = jax.nn.sigmoid(gates)                           # full-width EUP pass
        tnh = jnp.tanh(gates)                                 # full-width EUP pass
        i_g = sig[:, 0 * H:1 * H]
        f_g = sig[:, 1 * H:2 * H]
        g_g = tnh[:, 2 * H:3 * H]
        o_g = sig[:, 3 * H:4 * H]
        c_new = f_g * c + i_g * g_g
        h_new = o_g * jnp.tanh(c_new)
        return h_new, c_new, s + h_new

    zeros = jnp.zeros((B, H), jnp.float32)
    _, _, s = lax.fori_loop(0, T, step, (zeros, zeros, zeros), unroll=True)

    # ---- Temporal mean + fc ----
    avg = s * (1.0 / T)                                       # (B, H) f32
    out_ref[...] = (jnp.dot(avg.astype(jnp.bfloat16), wfc_ref[...],
                            preferred_element_type=jnp.float32)
                    + bfc_ref[...])


@jax.jit
def rnn_forward(words, params):
    """words: (B, T) int32 token ids.  Returns {'pred': (B, num_classes) f32}."""
    embed_tbl = params["embed"]                       # (V, E) f32
    w_ih = params["w_ih"].astype(jnp.bfloat16)        # (E, 4H)  == torch W_ih.T
    w_hh = params["w_hh"].astype(jnp.bfloat16)        # (H, 4H)  == torch W_hh.T
    b = params["b"]                                   # (1, 4H)  == b_ih + b_hh (f32)
    w_fc = params["w_fc"].astype(jnp.bfloat16)        # (H, C)   == torch fc.weight.T
    b_fc = params["b_fc"]                             # (1, C)   f32

    B, T = words.shape
    E = embed_tbl.shape[1]
    H = w_hh.shape[0]
    C = w_fc.shape[1]

    # Embedding gather directly in time-major layout (T, B, E); bf16 for MXU.
    x = jnp.take(embed_tbl, words.T, axis=0).astype(jnp.bfloat16)

    pred = pl.pallas_call(
        _lstm_mean_fc_kernel,
        out_shape=jax.ShapeDtypeStruct((B, C), jnp.float32),
        grid=(1,),
        in_specs=[
            pl.BlockSpec((T, B, E), lambda i: (0, 0, 0)),     # all of x
            pl.BlockSpec((E, 4 * H), lambda i: (0, 0)),       # W_ih^T (bf16)
            pl.BlockSpec((H, 4 * H), lambda i: (0, 0)),       # W_hh^T (bf16)
            pl.BlockSpec((1, 4 * H), lambda i: (0, 0)),       # bias (f32)
            pl.BlockSpec((H, C), lambda i: (0, 0)),           # fc weight^T (bf16)
            pl.BlockSpec((1, C), lambda i: (0, 0)),           # fc bias (f32)
        ],
        out_specs=pl.BlockSpec((B, C), lambda i: (0, 0)),
        scratch_shapes=[
            pltpu.VMEM((T, B, 4 * H), jnp.float32),           # precomputed x-projections
        ],
        compiler_params=pltpu.CompilerParams(
            dimension_semantics=("arbitrary",)),
    )(x, w_ih, w_hh, b, w_fc, b_fc)

    return {"pred": pred}


def rnn_predict(words, params):
    out = rnn_forward(words, params)
    return {"pred": jnp.argmax(out["pred"], axis=1)}


def init_params(key, vocab, embed_dim, hidden_dim, num_classes):
    """Deterministic synthetic parameters mirroring the torch module's shapes."""
    ks = jax.random.split(key, 7)
    k = 1.0 / jnp.sqrt(hidden_dim)
    u = lambda kk, shape, s: jax.random.uniform(kk, shape, jnp.float32, -s, s)
    # torch shapes: W_ih (4H, E), W_hh (4H, H), b_ih/b_hh (4H,), fc.W (C, H)
    w_ih_t = u(ks[0], (4 * hidden_dim, embed_dim), k)
    w_hh_t = u(ks[1], (4 * hidden_dim, hidden_dim), k)
    b_ih = u(ks[2], (4 * hidden_dim,), k)
    b_hh = u(ks[3], (4 * hidden_dim,), k)
    fc_w = u(ks[4], (num_classes, hidden_dim), 1.0 / jnp.sqrt(hidden_dim))
    fc_b = u(ks[5], (num_classes,), 1.0 / jnp.sqrt(hidden_dim))
    embed = jax.random.normal(ks[6], (vocab, embed_dim), jnp.float32)
    return {
        "embed": embed,
        "w_ih": w_ih_t.T,                          # (E, 4H)
        "w_hh": w_hh_t.T,                          # (H, 4H)
        "b": (b_ih + b_hh)[None, :],               # (1, 4H)
        "w_fc": fc_w.T,                            # (H, C)
        "b_fc": fc_b[None, :],                     # (1, C)
    }


def _reference(words, params):
    """Pure-JAX f32 reference of the same forward pass (for sanity checking)."""
    x = jnp.take(params["embed"], words.T, axis=0)            # (T, B, E) f32
    T, B, _ = x.shape
    H = params["w_hh"].shape[0]

    def step(carry, x_t):
        h, c = carry
        gates = x_t @ params["w_ih"] + h @ params["w_hh"] + params["b"]
        i_g = jax.nn.sigmoid(gates[:, 0 * H:1 * H])
        f_g = jax.nn.sigmoid(gates[:, 1 * H:2 * H])
        g_g = jnp.tanh(gates[:, 2 * H:3 * H])
        o_g = jax.nn.sigmoid(gates[:, 3 * H:4 * H])
        c_n = f_g * c + i_g * g_g
        h_n = o_g * jnp.tanh(c_n)
        return (h_n, c_n), h_n

    z = jnp.zeros((B, H), jnp.float32)
    (_, _), hs = lax.scan(step, (z, z), x)
    avg = hs.sum(0) / T
    return avg @ params["w_fc"] + params["b_fc"]


if __name__ == "__main__":
    B, T = 8, 8
    VOCAB, EMBED, HIDDEN, CLASSES = 100, 32, 32, 8

    key = jax.random.PRNGKey(0)
    k_words, k_params = jax.random.split(key)
    words = jax.random.randint(k_words, (B, T), 0, VOCAB, dtype=jnp.int32)
    params = init_params(k_params, VOCAB, EMBED, HIDDEN, CLASSES)

    out = rnn_forward(words, params)
    pred_logits = jax.block_until_ready(out["pred"])
    assert pred_logits.shape == (B, CLASSES)
    assert bool(jnp.all(jnp.isfinite(pred_logits)))

    # Correctness vs a pure-JAX f32 reference (loose tol: kernel uses bf16 matmuls).
    ref = jax.block_until_ready(_reference(words, params))
    assert float(jnp.max(jnp.abs(pred_logits - ref))) < 1e-1

    pred_cls = jax.block_until_ready(rnn_predict(words, params)["pred"])
    assert pred_cls.shape == (B,)

    print("KERNEL_OK")
</pallas_src>

<mosaic_0001>
module attributes {stable_mosaic.version = 11 : i64} {
  func.func @_lstm_mean_fc_kernel(%arg0: i32, %arg1: memref<8x8x32xbf16, #tpu.memory_space<vmem>>, %arg2: memref<32x128xbf16, #tpu.memory_space<vmem>>, %arg3: memref<32x128xbf16, #tpu.memory_space<vmem>>, %arg4: memref<1x128xf32, #tpu.memory_space<vmem>>, %arg5: memref<32x8xbf16, #tpu.memory_space<vmem>>, %arg6: memref<1x8xf32, #tpu.memory_space<vmem>>, %arg7: memref<8x8xf32, #tpu.memory_space<vmem>>, %arg8: memref<8x8x128xf32, #tpu.memory_space<vmem>>) attributes {dimension_semantics = [#tpu.dimension_semantics<arbitrary>], iteration_bounds = array<i64: 1>, scalar_prefetch = 0 : i64, scratch_operands = 1 : i64, tpu.core_type = #tpu.core_type<tc>, window_params = [{pipeline_mode = #tpu.pipeline_mode<synchronous>, transform_indices = @transform_0, window_bounds = array<i64: 8, 8, 32>}, {pipeline_mode = #tpu.pipeline_mode<synchronous>, transform_indices = @transform_1, window_bounds = array<i64: 32, 128>}, {pipeline_mode = #tpu.pipeline_mode<synchronous>, transform_indices = @transform_2, window_bounds = array<i64: 32, 128>}, {pipeline_mode = #tpu.pipeline_mode<synchronous>, transform_indices = @transform_3, window_bounds = array<i64: 1, 128>}, {pipeline_mode = #tpu.pipeline_mode<synchronous>, transform_indices = @transform_4, window_bounds = array<i64: 32, 8>}, {pipeline_mode = #tpu.pipeline_mode<synchronous>, transform_indices = @transform_5, window_bounds = array<i64: 1, 8>}, {pipeline_mode = #tpu.pipeline_mode<synchronous>, transform_indices = @transform_6, window_bounds = array<i64: 8, 8>}]} {
    %c0 = arith.constant 0 : index
    %c0_0 = arith.constant 0 : index
    %c0_1 = arith.constant 0 : index
    %0 = vector.load %arg1[%c0, %c0_0, %c0_1] : memref<8x8x32xbf16, #tpu.memory_space<vmem>>, vector<8x8x32xbf16>
    %1 = vector.shape_cast %0 : vector<8x8x32xbf16> to vector<64x32xbf16>
    %c0_2 = arith.constant 0 : index
    %c0_3 = arith.constant 0 : index
    %2 = vector.load %arg2[%c0_2, %c0_3] : memref<32x128xbf16, #tpu.memory_space<vmem>>, vector<32x128xbf16>
    %cst = arith.constant dense<0.000000e+00> : vector<64x128xf32>
    %3 = tpu.matmul %1, %2, %cst {dimension_numbers = #tpu.dot_dimension_numbers<[1], [0], [0], [1], [0, 0, 1, 1], [], []>} : vector<64x32xbf16>, vector<32x128xbf16>, vector<64x128xf32> -> vector<64x128xf32>
    %4 = vector.shape_cast %3 : vector<64x128xf32> to vector<8x8x128xf32>
    %c0_4 = arith.constant 0 : index
    %c0_5 = arith.constant 0 : index
    %5 = vector.load %arg4[%c0_4, %c0_5] : memref<1x128xf32, #tpu.memory_space<vmem>>, vector<1x128xf32>
    %6 = vector.shape_cast %5 : vector<1x128xf32> to vector<1x1x128xf32>
    %7 = vector.broadcast %6 : vector<1x1x128xf32> to vector<8x8x128xf32>
    %8 = arith.addf %4, %7 : vector<8x8x128xf32>
    %c0_6 = arith.constant 0 : index
    %c0_7 = arith.constant 0 : index
    %c0_8 = arith.constant 0 : index
    %9 = vector.load %arg8[%c0_6, %c0_7, %c0_8] : memref<8x8x128xf32, #tpu.memory_space<vmem>>, vector<8x8x128xf32>
    tpu.vector_store %arg8[%c0_6, %c0_7, %c0_8], %8 {strides = array<i32>} : memref<8x8x128xf32, #tpu.memory_space<vmem>>, vector<8x8x128xf32>,
    %c0_9 = arith.constant 0 : index
    %c0_10 = arith.constant 0 : index
    %10 = vector.load %arg3[%c0_9, %c0_10] : memref<32x128xbf16, #tpu.memory_space<vmem>>, vector<32x128xbf16>
    %cst_11 = arith.constant 0.000000e+00 : f32
    %11 = vector.broadcast %cst_11 : f32 to vector<8x32xf32>
    %c0_i32 = arith.constant 0 : i32
    %12 = arith.index_cast %c0_i32 : i32 to index
    %c0_12 = arith.constant 0 : index
    %c0_13 = arith.constant 0 : index
    %13 = vector.load %arg8[%12, %c0_12, %c0_13] : memref<8x8x128xf32, #tpu.memory_space<vmem>>, vector<1x8x128xf32>
    %14 = vector.shape_cast %13 : vector<1x8x128xf32> to vector<8x128xf32>
    %15 = arith.truncf %11 : vector<8x32xf32> to vector<8x32xbf16>
    %cst_14 = arith.constant dense<0.000000e+00> : vector<8x128xf32>
    %16 = tpu.matmul %15, %10, %cst_14 {dimension_numbers = #tpu.dot_dimension_numbers<[1], [0], [0], [1], [0, 0, 1, 1], [], []>} : vector<8x32xbf16>, vector<32x128xbf16>, vector<8x128xf32> -> vector<8x128xf32>
    %17 = arith.addf %14, %16 : vector<8x128xf32>
    %18 = arith.negf %17 : vector<8x128xf32>
    %19 = math.exp %18 : vector<8x128xf32>
    %cst_15 = arith.constant 1.000000e+00 : f32
    %20 = vector.broadcast %cst_15 : f32 to vector<8x128xf32>
    %21 = arith.addf %20, %19 : vector<8x128xf32>
    %22 = arith.divf %20, %21 : vector<8x128xf32>
    %23 = math.tanh %17 : vector<8x128xf32>
    %24 = vector.extract_strided_slice %22 {offsets = [0, 0], sizes = [8, 32], strides = [1, 1]} : vector<8x128xf32> to vector<8x32xf32>
    %25 = vector.extract_strided_slice %22 {offsets = [0, 32], sizes = [8, 32], strides = [1, 1]} : vector<8x128xf32> to vector<8x32xf32>
    %26 = vector.extract_strided_slice %23 {offsets = [0, 64], sizes = [8, 32], strides = [1, 1]} : vector<8x128xf32> to vector<8x32xf32>
    %27 = vector.extract_strided_slice %22 {offsets = [0, 96], sizes = [8, 32], strides = [1, 1]} : vector<8x128xf32> to vector<8x32xf32>
    %28 = arith.mulf %25, %11 : vector<8x32xf32>
    %29 = arith.mulf %24, %26 : vector<8x32xf32>
    %30 = arith.addf %28, %29 : vector<8x32xf32>
    %31 = math.tanh %30 : vector<8x32xf32>
    %32 = arith.mulf %27, %31 : vector<8x32xf32>
    %33 = arith.addf %11, %32 : vector<8x32xf32>
    %c1_i32 = arith.constant 1 : i32
    %34 = arith.index_cast %c1_i32 : i32 to index
    %c0_16 = arith.constant 0 : index
    %c0_17 = arith.constant 0 : index
    %35 = vector.load %arg8[%34, %c0_16, %c0_17] : memref<8x8x128xf32, #tpu.memory_space<vmem>>, vector<1x8x128xf32>
    %36 = vector.shape_cast %35 : vector<1x8x128xf32> to vector<8x128xf32>
    %37 = arith.truncf %32 : vector<8x32xf32> to vector<8x32xbf16>
    %cst_18 = arith.constant dense<0.000000e+00> : vector<8x128xf32>
    %38 = tpu.matmul %37, %10, %cst_18 {dimension_numbers = #tpu.dot_dimension_numbers<[1], [0], [0], [1], [0, 0, 1, 1], [], []>} : vector<8x32xbf16>, vector<32x128xbf16>, vector<8x128xf32> -> vector<8x128xf32>
    %39 = arith.addf %36, %38 : vector<8x128xf32>
    %40 = arith.negf %39 : vector<8x128xf32>
    %41 = math.exp %40 : vector<8x128xf32>
    %cst_19 = arith.constant 1.000000e+00 : f32
    %42 = vector.broadcast %cst_19 : f32 to vector<8x128xf32>
    %43 = arith.addf %42, %41 : vector<8x128xf32>
    %44 = arith.divf %42, %43 : vector<8x128xf32>
    %45 = math.tanh %39 : vector<8x128xf32>
    %46 = vector.extract_strided_slice %44 {offsets = [0, 0], sizes = [8, 32], strides = [1, 1]} : vector<8x128xf32> to vector<8x32xf32>
    %47 = vector.extract_strided_slice %44 {offsets = [0, 32], sizes = [8, 32], strides = [1, 1]} : vector<8x128xf32> to vector<8x32xf32>
    %48 = vector.extract_strided_slice %45 {offsets = [0, 64], sizes = [8, 32], strides = [1, 1]} : vector<8x128xf32> to vector<8x32xf32>
    %49 = vector.extract_strided_slice %44 {offsets = [0, 96], sizes = [8, 32], strides = [1, 1]} : vector<8x128xf32> to vector<8x32xf32>
    %50 = arith.mulf %47, %30 : vector<8x32xf32>
    %51 = arith.mulf %46, %48 : vector<8x32xf32>
    %52 = arith.addf %50, %51 : vector<8x32xf32>
    %53 = math.tanh %52 : vector<8x32xf32>
    %54 = arith.mulf %49, %53 : vector<8x32xf32>
    %55 = arith.addf %33, %54 : vector<8x32xf32>
    %c2_i32 = arith.constant 2 : i32
    %56 = arith.index_cast %c2_i32 : i32 to index
    %c0_20 = arith.constant 0 : index
    %c0_21 = arith.constant 0 : index
    %57 = vector.load %arg8[%56, %c0_20, %c0_21] : memref<8x8x128xf32, #tpu.memory_space<vmem>>, vector<1x8x128xf32>
    %58 = vector.shape_cast %57 : vector<1x8x128xf32> to vector<8x128xf32>
    %59 = arith.truncf %54 : vector<8x32xf32> to vector<8x32xbf16>
    %cst_22 = arith.constant dense<0.000000e+00> : vector<8x128xf32>
    %60 = tpu.matmul %59, %10, %cst_22 {dimension_numbers = #tpu.dot_dimension_numbers<[1], [0], [0], [1], [0, 0, 1, 1], [], []>} : vector<8x32xbf16>, vector<32x128xbf16>, vector<8x128xf32> -> vector<8x128xf32>
    %61 = arith.addf %58, %60 : vector<8x128xf32>
    %62 = arith.negf %61 : vector<8x128xf32>
    %63 = math.exp %62 : vector<8x128xf32>
    %cst_23 = arith.constant 1.000000e+00 : f32
    %64 = vector.broadcast %cst_23 : f32 to vector<8x128xf32>
    %65 = arith.addf %64, %63 : vector<8x128xf32>
    %66 = arith.divf %64, %65 : vector<8x128xf32>
    %67 = math.tanh %61 : vector<8x128xf32>
    %68 = vector.extract_strided_slice %66 {offsets = [0, 0], sizes = [8, 32], strides = [1, 1]} : vector<8x128xf32> to vector<8x32xf32>
    %69 = vector.extract_strided_slice %66 {offsets = [0, 32], sizes = [8, 32], strides = [1, 1]} : vector<8x128xf32> to vector<8x32xf32>
    %70 = vector.extract_strided_slice %67 {offsets = [0, 64], sizes = [8, 32], strides = [1, 1]} : vector<8x128xf32> to vector<8x32xf32>
    %71 = vector.extract_strided_slice %66 {offsets = [0, 96], sizes = [8, 32], strides = [1, 1]} : vector<8x128xf32> to vector<8x32xf32>
    %72 = arith.mulf %69, %52 : vector<8x32xf32>
    %73 = arith.mulf %68, %70 : vector<8x32xf32>
    %74 = arith.addf %72, %73 : vector<8x32xf32>
    %75 = math.tanh %74 : vector<8x32xf32>
    %76 = arith.mulf %71, %75 : vector<8x32xf32>
    %77 = arith.addf %55, %76 : vector<8x32xf32>
    %c3_i32 = arith.constant 3 : i32
    %78 = arith.index_cast %c3_i32 : i32 to index
    %c0_24 = arith.constant 0 : index
    %c0_25 = arith.constant 0 : index
    %79 = vector.load %arg8[%78, %c0_24, %c0_25] : memref<8x8x128xf32, #tpu.memory_space<vmem>>, vector<1x8x128xf32>
    %80 = vector.shape_cast %79 : vector<1x8x128xf32> to vector<8x128xf32>
    %81 = arith.truncf %76 : vector<8x32xf32> to vector<8x32xbf16>
    %cst_26 = arith.constant dense<0.000000e+00> : vector<8x128xf32>
    %82 = tpu.matmul %81, %10, %cst_26 {dimension_numbers = #tpu.dot_dimension_numbers<[1], [0], [0], [1], [0, 0, 1, 1], [], []>} : vector<8x32xbf16>, vector<32x128xbf16>, vector<8x128xf32> -> vector<8x128xf32>
    %83 = arith.addf %80, %82 : vector<8x128xf32>
    %84 = arith.negf %83 : vector<8x128xf32>
    %85 = math.exp %84 : vector<8x128xf32>
    %cst_27 = arith.constant 1.000000e+00 : f32
    %86 = vector.broadcast %cst_27 : f32 to vector<8x128xf32>
    %87 = arith.addf %86, %85 : vector<8x128xf32>
    %88 = arith.divf %86, %87 : vector<8x128xf32>
    %89 = math.tanh %83 : vector<8x128xf32>
    %90 = vector.extract_strided_slice %88 {offsets = [0, 0], sizes = [8, 32], strides = [1, 1]} : vector<8x128xf32> to vector<8x32xf32>
    %91 = vector.extract_strided_slice %88 {offsets = [0, 32], sizes = [8, 32], strides = [1, 1]} : vector<8x128xf32> to vector<8x32xf32>
    %92 = vector.extract_strided_slice %89 {offsets = [0, 64], sizes = [8, 32], strides = [1, 1]} : vector<8x128xf32> to vector<8x32xf32>
    %93 = vector.extract_strided_slice %88 {offsets = [0, 96], sizes = [8, 32], strides = [1, 1]} : vector<8x128xf32> to vector<8x32xf32>
    %94 = arith.mulf %91, %74 : vector<8x32xf32>
    %95 = arith.mulf %90, %92 : vector<8x32xf32>
    %96 = arith.addf %94, %95 : vector<8x32xf32>
    %97 = math.tanh %96 : vector<8x32xf32>
    %98 = arith.mulf %93, %97 : vector<8x32xf32>
    %99 = arith.addf %77, %98 : vector<8x32xf32>
    %c4_i32 = arith.constant 4 : i32
    %100 = arith.index_cast %c4_i32 : i32 to index
    %c0_28 = arith.constant 0 : index
    %c0_29 = arith.constant 0 : index
    %101 = vector.load %arg8[%100, %c0_28, %c0_29] : memref<8x8x128xf32, #tpu.memory_space<vmem>>, vector<1x8x128xf32>
    %102 = vector.shape_cast %101 : vector<1x8x128xf32> to vector<8x128xf32>
    %103 = arith.truncf %98 : vector<8x32xf32> to vector<8x32xbf16>
    %cst_30 = arith.constant dense<0.000000e+00> : vector<8x128xf32>
    %104 = tpu.matmul %103, %10, %cst_30 {dimension_numbers = #tpu.dot_dimension_numbers<[1], [0], [0], [1], [0, 0, 1, 1], [], []>} : vector<8x32xbf16>, vector<32x128xbf16>, vector<8x128xf32> -> vector<8x128xf32>
    %105 = arith.addf %102, %104 : vector<8x128xf32>
    %106 = arith.negf %105 : vector<8x128xf32>
    %107 = math.exp %106 : vector<8x128xf32>
    %cst_31 = arith.constant 1.000000e+00 : f32
    %108 = vector.broadcast %cst_31 : f32 to vector<8x128xf32>
    %109 = arith.addf %108, %107 : vector<8x128xf32>
    %110 = arith.divf %108, %109 : vector<8x128xf32>
    %111 = math.tanh %105 : vector<8x128xf32>
    %112 = vector.extract_strided_slice %110 {offsets = [0, 0], sizes = [8, 32], strides = [1, 1]} : vector<8x128xf32> to vector<8x32xf32>
    %113 = vector.extract_strided_slice %110 {offsets = [0, 32], sizes = [8, 32], strides = [1, 1]} : vector<8x128xf32> to vector<8x32xf32>
    %114 = vector.extract_strided_slice %111 {offsets = [0, 64], sizes = [8, 32], strides = [1, 1]} : vector<8x128xf32> to vector<8x32xf32>
    %115 = vector.extract_strided_slice %110 {offsets = [0, 96], sizes = [8, 32], strides = [1, 1]} : vector<8x128xf32> to vector<8x32xf32>
    %116 = arith.mulf %113, %96 : vector<8x32xf32>
    %117 = arith.mulf %112, %114 : vector<8x32xf32>
    %118 = arith.addf %116, %117 : vector<8x32xf32>
    %119 = math.tanh %118 : vector<8x32xf32>
    %120 = arith.mulf %115, %119 : vector<8x32xf32>
    %121 = arith.addf %99, %120 : vector<8x32xf32>
    %c5_i32 = arith.constant 5 : i32
    %122 = arith.index_cast %c5_i32 : i32 to index
    %c0_32 = arith.constant 0 : index
    %c0_33 = arith.constant 0 : index
    %123 = vector.load %arg8[%122, %c0_32, %c0_33] : memref<8x8x128xf32, #tpu.memory_space<vmem>>, vector<1x8x128xf32>
    %124 = vector.shape_cast %123 : vector<1x8x128xf32> to vector<8x128xf32>
    %125 = arith.truncf %120 : vector<8x32xf32> to vector<8x32xbf16>
    %cst_34 = arith.constant dense<0.000000e+00> : vector<8x128xf32>
    %126 = tpu.matmul %125, %10, %cst_34 {dimension_numbers = #tpu.dot_dimension_numbers<[1], [0], [0], [1], [0, 0, 1, 1], [], []>} : vector<8x32xbf16>, vector<32x128xbf16>, vector<8x128xf32> -> vector<8x128xf32>
    %127 = arith.addf %124, %126 : vector<8x128xf32>
    %128 = arith.negf %127 : vector<8x128xf32>
    %129 = math.exp %128 : vector<8x128xf32>
    %cst_35 = arith.constant 1.000000e+00 : f32
    %130 = vector.broadcast %cst_35 : f32 to vector<8x128xf32>
    %131 = arith.addf %130, %129 : vector<8x128xf32>
    %132 = arith.divf %130, %131 : vector<8x128xf32>
    %133 = math.tanh %127 : vector<8x128xf32>
    %134 = vector.extract_strided_slice %132 {offsets = [0, 0], sizes = [8, 32], strides = [1, 1]} : vector<8x128xf32> to vector<8x32xf32>
    %135 = vector.extract_strided_slice %132 {offsets = [0, 32], sizes = [8, 32], strides = [1, 1]} : vector<8x128xf32> to vector<8x32xf32>
    %136 = vector.extract_strided_slice %133 {offsets = [0, 64], sizes = [8, 32], strides = [1, 1]} : vector<8x128xf32> to vector<8x32xf32>
    %137 = vector.extract_strided_slice %132 {offsets = [0, 96], sizes = [8, 32], strides = [1, 1]} : vector<8x128xf32> to vector<8x32xf32>
    %138 = arith.mulf %135, %118 : vector<8x32xf32>
    %139 = arith.mulf %134, %136 : vector<8x32xf32>
    %140 = arith.addf %138, %139 : vector<8x32xf32>
    %141 = math.tanh %140 : vector<8x32xf32>
    %142 = arith.mulf %137, %141 : vector<8x32xf32>
    %143 = arith.addf %121, %142 : vector<8x32xf32>
    %c6_i32 = arith.constant 6 : i32
    %144 = arith.index_cast %c6_i32 : i32 to index
    %c0_36 = arith.constant 0 : index
    %c0_37 = arith.constant 0 : index
    %145 = vector.load %arg8[%144, %c0_36, %c0_37] : memref<8x8x128xf32, #tpu.memory_space<vmem>>, vector<1x8x128xf32>
    %146 = vector.shape_cast %145 : vector<1x8x128xf32> to vector<8x128xf32>
    %147 = arith.truncf %142 : vector<8x32xf32> to vector<8x32xbf16>
    %cst_38 = arith.constant dense<0.000000e+00> : vector<8x128xf32>
    %148 = tpu.matmul %147, %10, %cst_38 {dimension_numbers = #tpu.dot_dimension_numbers<[1], [0], [0], [1], [0, 0, 1, 1], [], []>} : vector<8x32xbf16>, vector<32x128xbf16>, vector<8x128xf32> -> vector<8x128xf32>
    %149 = arith.addf %146, %148 : vector<8x128xf32>
    %150 = arith.negf %149 : vector<8x128xf32>
    %151 = math.exp %150 : vector<8x128xf32>
    %cst_39 = arith.constant 1.000000e+00 : f32
    %152 = vector.broadcast %cst_39 : f32 to vector<8x128xf32>
    %153 = arith.addf %152, %151 : vector<8x128xf32>
    %154 = arith.divf %152, %153 : vector<8x128xf32>
    %155 = math.tanh %149 : vector<8x128xf32>
    %156 = vector.extract_strided_slice %154 {offsets = [0, 0], sizes = [8, 32], strides = [1, 1]} : vector<8x128xf32> to vector<8x32xf32>
    %157 = vector.extract_strided_slice %154 {offsets = [0, 32], sizes = [8, 32], strides = [1, 1]} : vector<8x128xf32> to vector<8x32xf32>
    %158 = vector.extract_strided_slice %155 {offsets = [0, 64], sizes = [8, 32], strides = [1, 1]} : vector<8x128xf32> to vector<8x32xf32>
    %159 = vector.extract_strided_slice %154 {offsets = [0, 96], sizes = [8, 32], strides = [1, 1]} : vector<8x128xf32> to vector<8x32xf32>
    %160 = arith.mulf %157, %140 : vector<8x32xf32>
    %161 = arith.mulf %156, %158 : vector<8x32xf32>
    %162 = arith.addf %160, %161 : vector<8x32xf32>
    %163 = math.tanh %162 : vector<8x32xf32>
    %164 = arith.mulf %159, %163 : vector<8x32xf32>
    %165 = arith.addf %143, %164 : vector<8x32xf32>
    %c7_i32 = arith.constant 7 : i32
    %166 = arith.index_cast %c7_i32 : i32 to index
    %c0_40 = arith.constant 0 : index
    %c0_41 = arith.constant 0 : index
    %167 = vector.load %arg8[%166, %c0_40, %c0_41] : memref<8x8x128xf32, #tpu.memory_space<vmem>>, vector<1x8x128xf32>
    %168 = vector.shape_cast %167 : vector<1x8x128xf32> to vector<8x128xf32>
    %169 = arith.truncf %164 : vector<8x32xf32> to vector<8x32xbf16>
    %cst_42 = arith.constant dense<0.000000e+00> : vector<8x128xf32>
    %170 = tpu.matmul %169, %10, %cst_42 {dimension_numbers = #tpu.dot_dimension_numbers<[1], [0], [0], [1], [0, 0, 1, 1], [], []>} : vector<8x32xbf16>, vector<32x128xbf16>, vector<8x128xf32> -> vector<8x128xf32>
    %171 = arith.addf %168, %170 : vector<8x128xf32>
    %172 = arith.negf %171 : vector<8x128xf32>
    %173 = math.exp %172 : vector<8x128xf32>
    %cst_43 = arith.constant 1.000000e+00 : f32
    %174 = vector.broadcast %cst_43 : f32 to vector<8x128xf32>
    %175 = arith.addf %174, %173 : vector<8x128xf32>
    %176 = arith.divf %174, %175 : vector<8x128xf32>
    %177 = math.tanh %171 : vector<8x128xf32>
    %178 = vector.extract_strided_slice %176 {offsets = [0, 0], sizes = [8, 32], strides = [1, 1]} : vector<8x128xf32> to vector<8x32xf32>
    %179 = vector.extract_strided_slice %176 {offsets = [0, 32], sizes = [8, 32], strides = [1, 1]} : vector<8x128xf32> to vector<8x32xf32>
    %180 = vector.extract_strided_slice %177 {offsets = [0, 64], sizes = [8, 32], strides = [1, 1]} : vector<8x128xf32> to vector<8x32xf32>
    %181 = vector.extract_strided_slice %176 {offsets = [0, 96], sizes = [8, 32], strides = [1, 1]} : vector<8x128xf32> to vector<8x32xf32>
    %182 = arith.mulf %179, %162 : vector<8x32xf32>
    %183 = arith.mulf %178, %180 : vector<8x32xf32>
    %184 = arith.addf %182, %183 : vector<8x32xf32>
    %185 = math.tanh %184 : vector<8x32xf32>
    %186 = arith.mulf %181, %185 : vector<8x32xf32>
    %187 = arith.addf %165, %186 : vector<8x32xf32>
    %c8_i32 = arith.constant 8 : i32
    %cst_44 = arith.constant 1.250000e-01 : f32
    %188 = vector.broadcast %cst_44 : f32 to vector<8x32xf32>
    %189 = arith.mulf %187, %188 : vector<8x32xf32>
    %190 = arith.truncf %189 : vector<8x32xf32> to vector<8x32xbf16>
    %c0_45 = arith.constant 0 : index
    %c0_46 = arith.constant 0 : index
    %191 = vector.load %arg5[%c0_45, %c0_46] : memref<32x8xbf16, #tpu.memory_space<vmem>>, vector<32x8xbf16>
    %cst_47 = arith.constant dense<0.000000e+00> : vector<8x8xf32>
    %192 = tpu.matmul %190, %191, %cst_47 {dimension_numbers = #tpu.dot_dimension_numbers<[1], [0], [0], [1], [0, 0, 1, 1], [], []>} : vector<8x32xbf16>, vector<32x8xbf16>, vector<8x8xf32> -> vector<8x8xf32>
    %c0_48 = arith.constant 0 : index
    %c0_49 = arith.constant 0 : index
    %193 = vector.load %arg6[%c0_48, %c0_49] : memref<1x8xf32, #tpu.memory_space<vmem>>, vector<1x8xf32>
    %194 = vector.broadcast %193 : vector<1x8xf32> to vector<8x8xf32>
    %195 = arith.addf %192, %194 : vector<8x8xf32>
    %c0_50 = arith.constant 0 : index
    %c0_51 = arith.constant 0 : index
    %196 = vector.load %arg7[%c0_50, %c0_51] : memref<8x8xf32, #tpu.memory_space<vmem>>, vector<8x8xf32>
    tpu.vector_store %arg7[%c0_50, %c0_51], %195 {strides = array<i32>} : memref<8x8xf32, #tpu.memory_space<vmem>>, vector<8x8xf32>,
    return
  }
  func.func @transform_0(%arg0: i32) -> (i32, i32, i32) {
    %c0_i32 = arith.constant 0 : i32
    %c0_i32_0 = arith.constant 0 : i32
    %c0_i32_1 = arith.constant 0 : i32
    %c0_i32_2 = arith.constant 0 : i32
    return %c0_i32, %c0_i32_0, %c0_i32_1 : i32, i32, i32
  }
  func.func @transform_1(%arg0: i32) -> (i32, i32) {
    %c0_i32 = arith.constant 0 : i32
    %c0_i32_0 = arith.constant 0 : i32
    %c0_i32_1 = arith.constant 0 : i32
    return %c0_i32, %c0_i32_0 : i32, i32
  }
  func.func @transform_2(%arg0: i32) -> (i32, i32) {
    %c0_i32 = arith.constant 0 : i32
    %c0_i32_0 = arith.constant 0 : i32
    %c0_i32_1 = arith.constant 0 : i32
    return %c0_i32, %c0_i32_0 : i32, i32
  }
  func.func @transform_3(%arg0: i32) -> (i32, i32) {
    %c0_i32 = arith.constant 0 : i32
    %c0_i32_0 = arith.constant 0 : i32
    %c0_i32_1 = arith.constant 0 : i32
    return %c0_i32, %c0_i32_0 : i32, i32
  }
  func.func @transform_4(%arg0: i32) -> (i32, i32) {
    %c0_i32 = arith.constant 0 : i32
    %c0_i32_0 = arith.constant 0 : i32
    %c0_i32_1 = arith.constant 0 : i32
    return %c0_i32, %c0_i32_0 : i32, i32
  }
  func.func @transform_5(%arg0: i32) -> (i32, i32) {
    %c0_i32 = arith.constant 0 : i32
    %c0_i32_0 = arith.constant 0 : i32
    %c0_i32_1 = arith.constant 0 : i32
    return %c0_i32, %c0_i32_0 : i32, i32
  }
  func.func @transform_6(%arg0: i32) -> (i32, i32) {
    %c0_i32 = arith.constant 0 : i32
    %c0_i32_0 = arith.constant 0 : i32
    %c0_i32_1 = arith.constant 0 : i32
    return %c0_i32, %c0_i32_0 : i32, i32
  }
}

</mosaic_0001>

<bundles_post_ra>
// kernel: rnn_forward.1
= control target key start
LH: loop header
LB: loop body
LE: loop exit
PB: predicated region body
PF: predicated region fallthrough
CT: control target
= control target key end

     0   :  { %v1119_v1 = vmov 0.0   ;;  %vm1120_vm0 = vmmov 0   ;;  %vm69_vm1 = vcmask 261120   ;;  %s1332_s0 = inlined_call_operand.vmem [shape: bf16[8,8,32], index: 0, kind: input, shape index: {}]   ;;  %s1333_s1 = inlined_call_operand.vmem [shape: bf16[32,128], index: 1, kind: input, shape index: {}]   ;;  %s1334_s2 = inlined_call_operand.vmem [shape: bf16[32,128], index: 2, kind: input, shape index: {}]   ;;  %s1335_s3 = inlined_call_operand.vmem [shape: f32[1,128], index: 3, kind: input, shape index: {}]   ;;  %s1336_s4 = inlined_call_operand.vmem [shape: bf16[32,8], index: 4, kind: input, shape index: {}]   ;;  %s1337_s5 = inlined_call_operand.vmem [shape: f32[1,8], index: 5, kind: input, shape index: {}]   ;;  %s1338_s6 = inlined_call_operand.hbm [shape: f32[8,8], index: 6, kind: output, shape index: {}]  }
   0x1   :  { %v1023_v0 = vld [vmem:[%s1333_s1 + $0x8] sm:$0xff]   ;;  %945 = vmatprep.subr.bf16.mxu1 %v1119_v1  ;;  %v1025_v3 = vld [vmem:[%s1333_s1] sm:$0xff]   ;;  %949 = vmatprep.mubr.msk.bf16.mxu1 %vm1120_vm0, %v1119_v1 }
   0x2   :  { %v1167_v2 = vld [vmem:[%s1334_s2 + $0x8] sm:$0xff]   ;;  %933 = vmatprep.subr.bf16.mxu0 %v1023_v0  ;;  %v1178_v4 = vld [vmem:[%s1334_s2] sm:$0xff]  }
   0x3   :  { %946 = vmatpush3.bf16.msra.mxu1 %v1167_v2  ;;  %934 = vmatpush3.bf16.msra.mxu0 %v1023_v0  ;;  %v1027_v5 = vld [vmem:[%s1332_s0] sm:$0xff]   ;;  %v1028_v6 = vld [vmem:[%s1332_s0 + $0x8] sm:$0xff]  }
   0x4   :  { %947 = vmatprep.subr.bf16.mxu1 %v1119_v1  ;;  %935 = vmatprep.subr.bf16.mxu0 %v1025_v3 }
   0x5   :  { %937 = vmatprep.mubr.msk.bf16.mxu0 %vm69_vm1, %v1027_v5 }
   0x7   :  { %948 = vmatpush3.bf16.msra.mxu1 %v1178_v4  ;;  %936 = vmatpush3.bf16.msra.mxu0 %v1025_v3 }
   0x8   :  { %953 = vmatprep.subr.bf16.mxu1 %v1119_v1  ;;  %961 = vmatprep.subr.bf16.mxu0 %v1119_v1 }
   0x9   :  { %11 = vsyncpa [#allocation4], 0  ;;  %v1121_v7 = vmov 0   ;;  %v1207_v10 = vld [vmem:[%s1335_s3] ss:$0 sm:$0xff]  ;;  %s1122_s9 = smov 64  }
   0xa   :  { %950 = vmatmul.mubr.bf16.vlgmr.msra.gmra.mxu1 %v1121_v7  ;;  %938 = vmatmul.mubr.msk.bf16.vlgmr.msra.gmra.mxu0 %vm69_vm1, %v1028_v6  ;;  %s1123_s3 = smov 32   ;;  %v1029_v50 = vld [vmem:[%s1332_s0 + $0x10] sm:$0xff]   ;;  %v1030_v51 = vld [vmem:[%s1332_s0 + $0x18] sm:$0xff]   ;;  %vm852_vm2 = vcmask 64512  }
   0xb   :  { %954 = vmatpush3.bf16.msra.mxu1 %v1167_v2  ;;  %957 = vmatprep.mubr.msk.bf16.mxu1 %vm1120_vm0, %v1119_v1 }
   0xc   :  { %955 = vmatprep.subr.bf16.mxu1 %v1119_v1  ;;  %962 = vmatpush3.bf16.msra.mxu0 %v1167_v2 }
   0xd   :  { %963 = vmatprep.subr.bf16.mxu0 %v1119_v1  ;;  %941 = vmatprep.mubr.msk.bf16.mxu0 %vm69_vm1, %v1029_v50 }
   0xf   :  { %956 = vmatpush3.bf16.msra.mxu1 %v1178_v4 }
  0x10   :  { %964 = vmatpush3.bf16.msra.mxu0 %v1178_v4  ;;  %969 = vmatprep.subr.bf16.mxu1 %v1119_v1 }
  0x11   :  { %977 = vmatprep.subr.bf16.mxu0 %v1119_v1 }
  0x12   :  { %942 = vmatmul.mubr.msk.bf16.gmra.mxu0 %vm69_vm1, %v1030_v51 }
  0x13   :  { %965 = vmatprep.mubr.msk.bf16.mxu0 %vm1120_vm0, %v1119_v1 }
  0xca   :  { %v224_v8 = vpop.f32.mrf.mxu1  ;;  %v1202_v9 = vpop.f32.mrf.mxu0 }
  0xcb   :  { %v156_v61 = vadd.f32 %v1202_v9, %v1207_v10 }
  0xcc   :  { %v951_v11 = vpop.f32.mrf.mxu1  ;;  %v116_v12 = vpop.f32.mrf.mxu0 }
  0xcd   :  { %v154_v13 = vadd.f32 %v1207_v10, %v116_v12 }
  0xce   :  { %v227_v14 = vpop.f32.mrf.mxu1  ;;  %v1225_v32 = vpop.f32.mrf.mxu0 }
  0xcf   :  { %v230_v15 = vadd.f32 %v224_v8, %v154_v13 }
  0xd0   :  { %v952_v16 = vpop.f32.mrf.mxu1  ;;  %v119_v33 = vpop.f32.mrf.mxu0 }
  0xd1   :  { %1033 = vtanh.f32 %v230_v15  ;;  %v881_v18 = vmul.f32 -1.442695, %v230_v15  ;;  %v155_v34 = vadd.f32 %v1207_v10, %v119_v33 }
  0xd2   :  { %v1249_v57 = vpop.f32.mrf.mxu0 }
  0xd3   :  { %1035 = vpow2.f32 %v881_v18 }
  0xd4   :  { %v1251_v58 = vpop.f32.mrf.mxu0 }
  0xd6   :  { %v1253_v59 = vpop.f32.mrf.mxu0 }
  0xd8   :  { %v1255_v60 = vpop.f32.mrf.mxu0 }
  0xde   :  { %v1034_v17 = vpop.eup %1033 }
  0xdf   :  { %240 = vrot.lane.b32.xlu0 %v1034_v17, %s1122_s9 }
  0xe0   :  { %v1036_v19 = vpop.eup %1035 }
  0xe1   :  { %v234_v20 = vadd.f32 1.0, %v1036_v19 }
  0xe3   :  { %1037 = vrcp.f32 %v234_v20 }
  0xf0   :  { %v1038_v21 = vpop.eup %1037 }
  0xf1   :  { %v238_v24 = vmul.f32 0.0, %v1038_v21 }
 0x151   :  { %v241_v22 = vpop.permute.xlu0 %240 }
 0x152   :  { %v243_v23 = vmul.f32 %v1038_v21, %v241_v22 }
 0x154   :  { %245 = vrot.lane.b32.xlu0 %v243_v23, %s1123_s3 }
 0x1c6   :  { %v246_v25 = vpop.permute.xlu0 %245 }
 0x1c7   :  { %v248_v26 = vadd.f32 %v246_v25, %v238_v24  ;;  %v157_v24 = vadd.f32 %v1225_v32, %v1207_v10 }
 0x1c9   :  { %1039 = vtanh.f32 %v248_v26 }
 0x1d6   :  { %v1040_v27 = vpop.eup %1039 }
 0x1d7   :  { %251 = vrot.lane.b32.xlu1 %v1040_v27, %s1122_s9 }
 0x249   :  { %v252_v28 = vpop.permute.xlu1 %251 }
 0x24a   :  { %v1213_v29 = vmul.f32 %v1038_v21, %v252_v28 }
 0x24c   :  { %v258_v30 = vpack.c.bf16 %v1213_v29, %v1213_v29 }
 0x24e   :  { %260 = vrot.lane.b32.xlu1 %v258_v30, %s1123_s3 }
 0x2c0   :  { %v261_v31 = vpop.permute.xlu1 %260 }
 0x2c1   :  { %958 = vmatmul.mubr.msk.bf16.vlgmr.msra.gmra.mxu1 %vm69_vm1, %v261_v31 }
 0x2c2   :  { %970 = vmatpush3.bf16.msra.mxu1 %v1167_v2  ;;  %973 = vmatprep.mubr.msk.bf16.mxu1 %vm1120_vm0, %v1119_v1 }
 0x2c3   :  { %971 = vmatprep.subr.bf16.mxu1 %v1119_v1 }
 0x2c6   :  { %972 = vmatpush3.bf16.msra.mxu1 %v1178_v4 }
 0x2c7   :  { %985 = vmatprep.subr.bf16.mxu1 %v1119_v1 }
 0x381   :  { %v299_v35 = vpop.f32.mrf.mxu1 }
 0x382   :  { %v305_v36 = vadd.f32 %v299_v35, %v155_v34 }
 0x383   :  { %v959_v37 = vpop.f32.mrf.mxu1 }
 0x384   :  { %1041 = vtanh.f32 %v305_v36  ;;  %v883_v41 = vmul.f32 -1.442695, %v305_v36 }
 0x385   :  { %v302_v38 = vpop.f32.mrf.mxu1 }
 0x386   :  { %1043 = vpow2.f32 %v883_v41 }
 0x387   :  { %v960_v39 = vpop.f32.mrf.mxu1 }
 0x391   :  { %v1042_v40 = vpop.eup %1041 }
 0x392   :  { %315 = vrot.lane.b32.xlu0 %v1042_v40, %s1122_s9 }
 0x393   :  { %v1044_v42 = vpop.eup %1043 }
 0x394   :  { %v309_v43 = vadd.f32 1.0, %v1044_v42 }
 0x396   :  { %1045 = vrcp.f32 %v309_v43 }
 0x3a3   :  { %v1046_v44 = vpop.eup %1045 }
 0x3a4   :  { %v313_v47 = vmul.f32 %v1046_v44, %v248_v26 }
 0x404   :  { %v316_v45 = vpop.permute.xlu0 %315 }
 0x405   :  { %v318_v46 = vmul.f32 %v1046_v44, %v316_v45 }
 0x407   :  { %320 = vrot.lane.b32.xlu1 %v318_v46, %s1123_s3  ;;  %v158_v46 = vadd.f32 %v1207_v10, %v1251_v58 }
 0x479   :  { %v321_v48 = vpop.permute.xlu1 %320 }
 0x47a   :  { %v323_v49 = vadd.f32 %v321_v48, %v313_v47 }
 0x47c   :  { %1047 = vtanh.f32 %v323_v49 }
 0x489   :  { %v1048_v52 = vpop.eup %1047 }
 0x48a   :  { %326 = vrot.lane.b32.xlu0 %v1048_v52, %s1122_s9 }
 0x4fc   :  { %v327_v53 = vpop.permute.xlu0 %326 }
 0x4fd   :  { %v329_v54 = vmul.f32 %v1046_v44, %v327_v53 }
 0x4ff   :  { %v333_v55 = vpack.c.bf16 %v329_v54, %v329_v54  ;;  %v330_v19 = vadd.f32 %v329_v54, %v1213_v29 }
 0x501   :  { %335 = vrot.lane.b32.xlu1 %v333_v55, %s1123_s3 }
 0x573   :  { %v336_v56 = vpop.permute.xlu1 %335 }
 0x574   :  { %966 = vmatmul.mubr.msk.bf16.vlgmr.msra.gmra.mxu0 %vm69_vm1, %v336_v56 }
 0x575   :  { %978 = vmatpush3.bf16.msra.mxu0 %v1167_v2  ;;  %981 = vmatprep.mubr.msk.bf16.mxu0 %vm1120_vm0, %v1119_v1 }
 0x576   :  { %979 = vmatprep.subr.bf16.mxu0 %v1119_v1 }
 0x579   :  { %980 = vmatpush3.bf16.msra.mxu0 %v1178_v4 }
 0x57a   :  { %993 = vmatprep.subr.bf16.mxu0 %v1119_v1 }
 0x634   :  { %v374_v62 = vpop.f32.mrf.mxu0 }
 0x635   :  { %v380_v63 = vadd.f32 %v374_v62, %v156_v61 }
 0x636   :  { %v967_v0 = vpop.f32.mrf.mxu0 }
 0x637   :  { %1049 = vtanh.f32 %v380_v63  ;;  %v885_v7 = vmul.f32 -1.442695, %v380_v63 }
 0x638   :  { %v377_v3 = vpop.f32.mrf.mxu0 }
 0x639   :  { %1051 = vpow2.f32 %v885_v7 }
 0x63a   :  { %v968_v5 = vpop.f32.mrf.mxu0 }
 0x644   :  { %v1050_v6 = vpop.eup %1049 }
 0x645   :  { %390 = vrot.lane.b32.xlu0 %v1050_v6, %s1122_s9 }
 0x646   :  { %v1052_v8 = vpop.eup %1051 }
 0x647   :  { %v384_v11 = vadd.f32 1.0, %v1052_v8 }
 0x649   :  { %1053 = vrcp.f32 %v384_v11 }
 0x656   :  { %v1054_v12 = vpop.eup %1053 }
 0x657   :  { %v388_v9 = vmul.f32 %v1054_v12, %v323_v49 }
 0x6b7   :  { %v391_v13 = vpop.permute.xlu0 %390 }
 0x6b8   :  { %v393_v14 = vmul.f32 %v1054_v12, %v391_v13 }
 0x6ba   :  { %395 = vrot.lane.b32.xlu1 %v393_v14, %s1123_s3 }
 0x72c   :  { %v396_v15 = vpop.permute.xlu1 %395 }
 0x72d   :  { %v398_v16 = vadd.f32 %v396_v15, %v388_v9 }
 0x72f   :  { %1055 = vtanh.f32 %v398_v16 }
 0x73c   :  { %v1056_v17 = vpop.eup %1055 }
 0x73d   :  { %401 = vrot.lane.b32.xlu0 %v1056_v17, %s1122_s9 }
 0x7af   :  { %v402_v18 = vpop.permute.xlu0 %401 }
 0x7b0   :  { %v404_v20 = vmul.f32 %v1054_v12, %v402_v18  ;;  %v159_v12 = vadd.f32 %v1207_v10, %v1255_v60 }
 0x7b2   :  { %v405_v21 = vadd.f32 %v404_v20, %v330_v19  ;;  %v408_v22 = vpack.c.bf16 %v404_v20, %v404_v20 }
 0x7b4   :  { %410 = vrot.lane.b32.xlu1 %v408_v22, %s1123_s3 }
 0x826   :  { %v411_v23 = vpop.permute.xlu1 %410 }
 0x827   :  { %974 = vmatmul.mubr.msk.bf16.vlgmr.msra.gmra.mxu1 %vm69_vm1, %v411_v23 }
 0x828   :  { %986 = vmatpush3.bf16.msra.mxu1 %v1167_v2  ;;  %989 = vmatprep.mubr.msk.bf16.mxu1 %vm1120_vm0, %v1119_v1 }
 0x829   :  { %987 = vmatprep.subr.bf16.mxu1 %v1119_v1 }
 0x82c   :  { %988 = vmatpush3.bf16.msra.mxu1 %v1178_v4 }
 0x82d   :  { %1001 = vmatprep.subr.bf16.mxu1 %v1119_v1 }
 0x8e7   :  { %v449_v25 = vpop.f32.mrf.mxu1 }
 0x8e8   :  { %v455_v26 = vadd.f32 %v449_v25, %v157_v24 }
 0x8e9   :  { %v975_v27 = vpop.f32.mrf.mxu1 }
 0x8ea   :  { %1057 = vtanh.f32 %v455_v26  ;;  %v887_v31 = vmul.f32 -1.442695, %v455_v26 }
 0x8eb   :  { %v452_v28 = vpop.f32.mrf.mxu1 }
 0x8ec   :  { %1059 = vpow2.f32 %v887_v31 }
 0x8ed   :  { %v976_v29 = vpop.f32.mrf.mxu1 }
 0x8f7   :  { %v1058_v30 = vpop.eup %1057 }
 0x8f8   :  { %465 = vrot.lane.b32.xlu0 %v1058_v30, %s1122_s9  ;;  %v160_v30 = vadd.f32 %v1249_v57, %v1207_v10 }
 0x8f9   :  { %v1060_v33 = vpop.eup %1059 }
 0x8fa   :  { %v459_v34 = vadd.f32 1.0, %v1060_v33 }
 0x8fc   :  { %1061 = vrcp.f32 %v459_v34 }
 0x909   :  { %v1062_v35 = vpop.eup %1061 }
 0x90a   :  { %v463_v32 = vmul.f32 %v1062_v35, %v398_v16 }
 0x96a   :  { %v466_v36 = vpop.permute.xlu0 %465 }
 0x96b   :  { %v468_v37 = vmul.f32 %v1062_v35, %v466_v36 }
 0x96d   :  { %470 = vrot.lane.b32.xlu1 %v468_v37, %s1123_s3 }
 0x9df   :  { %v471_v38 = vpop.permute.xlu1 %470 }
 0x9e0   :  { %v473_v39 = vadd.f32 %v471_v38, %v463_v32 }
 0x9e2   :  { %1063 = vtanh.f32 %v473_v39 }
 0x9ef   :  { %v1064_v40 = vpop.eup %1063 }
 0x9f0   :  { %476 = vrot.lane.b32.xlu0 %v1064_v40, %s1122_s9 }
 0xa62   :  { %v477_v41 = vpop.permute.xlu0 %476 }
 0xa63   :  { %v479_v42 = vmul.f32 %v1062_v35, %v477_v41 }
 0xa65   :  { %v480_v43 = vadd.f32 %v479_v42, %v405_v21  ;;  %v483_v44 = vpack.c.bf16 %v479_v42, %v479_v42 }
 0xa67   :  { %485 = vrot.lane.b32.xlu1 %v483_v44, %s1123_s3 }
 0xad9   :  { %v486_v45 = vpop.permute.xlu1 %485 }
 0xada   :  { %982 = vmatmul.mubr.msk.bf16.vlgmr.msra.gmra.mxu0 %vm69_vm1, %v486_v45 }
 0xadb   :  { %994 = vmatpush3.bf16.msra.mxu0 %v1167_v2  ;;  %997 = vmatprep.mubr.msk.bf16.mxu0 %vm1120_vm0, %v1119_v1 }
 0xadc   :  { %995 = vmatprep.subr.bf16.mxu0 %v1119_v1 }
 0xadf   :  { %996 = vmatpush3.bf16.msra.mxu0 %v1178_v4 }
 0xae0   :  { %1009 = vmatprep.subr.bf16.mxu0 %v1119_v1 }
 0xb9a   :  { %v524_v47 = vpop.f32.mrf.mxu0 }
 0xb9b   :  { %v530_v48 = vadd.f32 %v524_v47, %v158_v46 }
 0xb9c   :  { %v983_v49 = vpop.f32.mrf.mxu0 }
 0xb9d   :  { %1065 = vtanh.f32 %v530_v48  ;;  %v889_v53 = vmul.f32 -1.442695, %v530_v48 }
 0xb9e   :  { %v527_v50 = vpop.f32.mrf.mxu0 }
 0xb9f   :  { %1067 = vpow2.f32 %v889_v53 }
 0xba0   :  { %v984_v51 = vpop.f32.mrf.mxu0 }
 0xba1   :  { %v161_v51 = vadd.f32 %v1253_v59, %v1207_v10 }
 0xbaa   :  { %v1066_v52 = vpop.eup %1065 }
 0xbab   :  { %540 = vrot.lane.b32.xlu0 %v1066_v52, %s1122_s9 }
 0xbac   :  { %v1068_v54 = vpop.eup %1067 }
 0xbad   :  { %v534_v55 = vadd.f32 1.0, %v1068_v54 }
 0xbaf   :  { %1069 = vrcp.f32 %v534_v55 }
 0xbbc   :  { %v1070_v56 = vpop.eup %1069 }
 0xbbd   :  { %v538_v58 = vmul.f32 %v1070_v56, %v473_v39 }
 0xc1d   :  { %v541_v61 = vpop.permute.xlu0 %540 }
 0xc1e   :  { %v543_v62 = vmul.f32 %v1070_v56, %v541_v61 }
 0xc20   :  { %545 = vrot.lane.b32.xlu1 %v543_v62, %s1123_s3 }
 0xc92   :  { %v546_v63 = vpop.permute.xlu1 %545 }
 0xc93   :  { %v548_v0 = vadd.f32 %v546_v63, %v538_v58 }
 0xc95   :  { %1071 = vtanh.f32 %v548_v0 }
 0xca2   :  { %v1072_v3 = vpop.eup %1071 }
 0xca3   :  { %551 = vrot.lane.b32.xlu0 %v1072_v3, %s1122_s9 }
 0xd15   :  { %v552_v5 = vpop.permute.xlu0 %551 }
 0xd16   :  { %v554_v6 = vmul.f32 %v1070_v56, %v552_v5 }
 0xd18   :  { %v555_v7 = vadd.f32 %v554_v6, %v480_v43  ;;  %v558_v8 = vpack.c.bf16 %v554_v6, %v554_v6 }
 0xd1a   :  { %560 = vrot.lane.b32.xlu1 %v558_v8, %s1123_s3  ;;  %v1032_v8 = vld [vmem:[%s1336_s4] sm:$0xff]  }
 0xd8c   :  { %v561_v11 = vpop.permute.xlu1 %560 }
 0xd8d   :  { %990 = vmatmul.mubr.msk.bf16.vlgmr.msra.gmra.mxu1 %vm69_vm1, %v561_v11 }
 0xd8e   :  { %1002 = vmatpush3.bf16.msra.mxu1 %v1167_v2  ;;  %1005 = vmatprep.mubr.msk.bf16.mxu1 %vm1120_vm0, %v1119_v1 }
 0xd8f   :  { %1003 = vmatprep.subr.bf16.mxu1 %v1119_v1 }
 0xd92   :  { %1004 = vmatpush3.bf16.msra.mxu1 %v1178_v4 }
 0xe4d   :  { %v599_v13 = vpop.f32.mrf.mxu1 }
 0xe4e   :  { %v605_v14 = vadd.f32 %v599_v13, %v159_v12 }
 0xe4f   :  { %v991_v9 = vpop.f32.mrf.mxu1 }
 0xe50   :  { %1073 = vtanh.f32 %v605_v14  ;;  %v891_v2 = vmul.f32 -1.442695, %v605_v14 }
 0xe51   :  { %v602_v15 = vpop.f32.mrf.mxu1 }
 0xe52   :  { %1075 = vpow2.f32 %v891_v2 }
 0xe53   :  { %v992_v16 = vpop.f32.mrf.mxu1 }
 0xe5d   :  { %v1074_v17 = vpop.eup %1073 }
 0xe5e   :  { %615 = vrot.lane.b32.xlu0 %v1074_v17, %s1122_s9  ;;  %v896_v17 = vld [vmem:[%s1337_s5] ss:$0 sm:$0xff] }
 0xe5f   :  { %v1076_v18 = vpop.eup %1075 }
 0xe60   :  { %v609_v19 = vadd.f32 1.0, %v1076_v18 }
 0xe62   :  { %1077 = vrcp.f32 %v609_v19 }
 0xe6f   :  { %v1078_v20 = vpop.eup %1077 }
 0xe70   :  { %v613_v60 = vmul.f32 %v1078_v20, %v548_v0 }
 0xed0   :  { %v616_v21 = vpop.permute.xlu0 %615 }
 0xed1   :  { %v618_v4 = vmul.f32 %v1078_v20, %v616_v21 }
 0xed3   :  { %620 = vrot.lane.b32.xlu1 %v618_v4, %s1123_s3 }
 0xf45   :  { %v621_v22 = vpop.permute.xlu1 %620 }
 0xf46   :  { %v623_v23 = vadd.f32 %v621_v22, %v613_v60 }
 0xf48   :  { %1079 = vtanh.f32 %v623_v23 }
 0xf55   :  { %v1080_v24 = vpop.eup %1079 }
 0xf56   :  { %626 = vrot.lane.b32.xlu0 %v1080_v24, %s1122_s9 }
 0xfc8   :  { %v627_v25 = vpop.permute.xlu0 %626 }
 0xfc9   :  { %v629_v26 = vmul.f32 %v1078_v20, %v627_v25 }
 0xfcb   :  { %v630_v27 = vadd.f32 %v629_v26, %v555_v7  ;;  %v633_v28 = vpack.c.bf16 %v629_v26, %v629_v26  ;;  %v1031_v7 = vld [vmem:[%s1336_s4 + $0x8] sm:$0xff]   ;;  %s1124_s4 = smov [#allocation3]  }
 0xfcc   :  { %s860_s19 = sshll.u32 %s1124_s4, 4  ;;  %s861_s19 = int_to_ptr.vmem [resolvable:$true] %s860_s19 }
 0xfcd   :  { %635 = vrot.lane.b32.xlu1 %v633_v28, %s1123_s3  ;;  %s1097_s20 = scalar_lea.vmem %s861_s19, 128  ;;  %p1102_p1 = scmp.lt.s32.totalorder %s861_s19, %s861_s19 }
 0xfce   :  { %p1098_p0 = scmp.ne.s32.totalorder %s861_s19, %s1097_s20  ;;  %p1103_p2 = scmp.lt.s32.totalorder %s1097_s20, %s1097_s20 }
 0xfd0   :  { %p1104_p3 = por %p1103_p2, %p1102_p1 }
 0xfd2   :  { %p1105_p4 = pnand %p1104_p3, %p1098_p0 }
0x103f   :  { %v636_v29 = vpop.permute.xlu1 %635 }
0x1040   :  { %998 = vmatmul.mubr.msk.bf16.vlgmr.msra.gmra.mxu0 %vm69_vm1, %v636_v29 }
0x1041   :  { %1013 = vmatprep.mubr.msk.bf16.mxu0 %vm1120_vm0, %v1119_v1  ;;  %1010 = vmatpush3.bf16.msra.mxu0 %v1031_v7 }
0x1042   :  { %1011 = vmatprep.subr.bf16.mxu0 %v1119_v1 }
0x1045   :  { %1012 = vmatpush3.bf16.msra.mxu0 %v1032_v8 }
0x1100   :  { %v674_v31 = vpop.f32.mrf.mxu0 }
0x1101   :  { %v680_v33 = vadd.f32 %v674_v31, %v160_v30 }
0x1102   :  { %v999_v34 = vpop.f32.mrf.mxu0 }
0x1103   :  { %1081 = vtanh.f32 %v680_v33  ;;  %v893_v32 = vmul.f32 -1.442695, %v680_v33 }
0x1104   :  { %v677_v35 = vpop.f32.mrf.mxu0 }
0x1105   :  { %1083 = vpow2.f32 %v893_v32 }
0x1106   :  { %v1000_v36 = vpop.f32.mrf.mxu0 }
0x1110   :  { %v1082_v37 = vpop.eup %1081 }
0x1111   :  { %690 = vrot.lane.b32.xlu0 %v1082_v37, %s1122_s9 }
0x1112   :  { %v1084_v38 = vpop.eup %1083 }
0x1113   :  { %v684_v39 = vadd.f32 1.0, %v1084_v38 }
0x1115   :  { %1085 = vrcp.f32 %v684_v39 }
0x1122   :  { %v1086_v40 = vpop.eup %1085 }
0x1123   :  { %v688_v57 = vmul.f32 %v1086_v40, %v623_v23 }
0x1183   :  { %v691_v41 = vpop.permute.xlu0 %690 }
0x1184   :  { %v693_v42 = vmul.f32 %v1086_v40, %v691_v41 }
0x1186   :  { %695 = vrot.lane.b32.xlu1 %v693_v42, %s1123_s3 }
0x11f8   :  { %v696_v43 = vpop.permute.xlu1 %695 }
0x11f9   :  { %v698_v44 = vadd.f32 %v696_v43, %v688_v57 }
0x11fb   :  { %1087 = vtanh.f32 %v698_v44 }
0x1208   :  { %v1088_v45 = vpop.eup %1087 }
0x1209   :  { %701 = vrot.lane.b32.xlu0 %v1088_v45, %s1122_s9 }
0x127b   :  { %v702_v46 = vpop.permute.xlu0 %701 }
0x127c   :  { %v704_v47 = vmul.f32 %v1086_v40, %v702_v46 }
0x127e   :  { %v705_v48 = vadd.f32 %v704_v47, %v630_v27  ;;  %v708_v49 = vpack.c.bf16 %v704_v47, %v704_v47 }
0x1280   :  { %710 = vrot.lane.b32.xlu1 %v708_v49, %s1123_s3 }
0x12f2   :  { %v711_v50 = vpop.permute.xlu1 %710 }
0x12f3   :  { %1006 = vmatmul.mubr.msk.bf16.vlgmr.msra.gmra.mxu1 %vm69_vm1, %v711_v50 }
0x13b3   :  { %v749_v52 = vpop.f32.mrf.mxu1 }
0x13b4   :  { %v755_v53 = vadd.f32 %v749_v52, %v161_v51 }
0x13b5   :  { %v1007_v54 = vpop.f32.mrf.mxu1 }
0x13b6   :  { %1089 = vtanh.f32 %v755_v53  ;;  %v895_v62 = vmul.f32 -1.442695, %v755_v53 }
0x13b7   :  { %v752_v55 = vpop.f32.mrf.mxu1 }
0x13b8   :  { %1091 = vpow2.f32 %v895_v62 }
0x13b9   :  { %v1008_v56 = vpop.f32.mrf.mxu1 }
0x13c3   :  { %v1090_v61 = vpop.eup %1089 }
0x13c4   :  { %765 = vrot.lane.b32.xlu0 %v1090_v61, %s1122_s9 }
0x13c5   :  { %v1092_v58 = vpop.eup %1091 }
0x13c6   :  { %v759_v63 = vadd.f32 1.0, %v1092_v58 }
0x13c8   :  { %1093 = vrcp.f32 %v759_v63 }
0x13d5   :  { %v1094_v0 = vpop.eup %1093 }
0x13d6   :  { %v763_v10 = vmul.f32 %v1094_v0, %v698_v44 }
0x1436   :  { %v766_v3 = vpop.permute.xlu0 %765 }
0x1437   :  { %v768_v5 = vmul.f32 %v1094_v0, %v766_v3 }
0x1439   :  { %770 = vrot.lane.b32.xlu1 %v768_v5, %s1123_s3 }
0x14ab   :  { %v771_v59 = vpop.permute.xlu1 %770 }
0x14ac   :  { %v773_v6 = vadd.f32 %v771_v59, %v763_v10 }
0x14ae   :  { %1095 = vtanh.f32 %v773_v6 }
0x14bb   :  { %v1096_v11 = vpop.eup %1095 }
0x14bc   :  { %776 = vrot.lane.b32.xlu0 %v1096_v11, %s1122_s9 }
0x152e   :  { %v777_v12 = vpop.permute.xlu0 %776 }
0x152f   :  { %v779_v13 = vmul.f32 %v1094_v0, %v777_v12 }
0x1531   :  { %v780_v14 = vadd.f32 %v779_v13, %v705_v48 }
0x1533   :  { %v781_v9 = vmul.f32 0.125, %v780_v14 }
0x1535   :  { %v782_v15 = vpack.c.bf16 %v781_v9, %v781_v9 }
0x1537   :  { %795 = vrot.lane.b32.xlu1 %v782_v15, %s1123_s3 }
0x15a9   :  { %v796_v16 = vpop.permute.xlu1 %795 }
0x15aa   :  { %1014 = vmatmul.mubr.msk.bf16.vlgmr.msra.gmra.mxu0 %vm69_vm1, %v796_v16 }
0x166a   :  { %v846_v1 = vpop.f32.mrf.mxu0 }
0x166b   :  { %v847_v2 = vadd.f32 %v896_v17, %v846_v1 }
0x166c   :  { %v1015_v18 = vpop.f32.mrf.mxu0 }
0x166d   :  { %853 = vst.msk [vmem:[#allocation3] sm:$0xff] %vm852_vm2, %v847_v2 }
0x166e   :  { %v849_v19 = vpop.f32.mrf.mxu0 }
0x166f   :  { %1108 = shalt.err (!%p1105_p4)
}
0x1670   :  { %863 = dma.vmem_to_hbm [thread:$0]  %s861_s19, 128, %s1338_s6, [#allocation4]   ;;  %v1016_v20 = vpop.f32.mrf.mxu0 }
0x1671   :  { %1117 = dma.done.wait [#allocation4], 128  }
0x1672   :  { %1118 = vsyncadd [#allocation4], 4294967168 }
0x1673   :  { %867 = vsyncpa [#allocation4], 1 }

</bundles_post_ra>
